<compile_context>
chip_gen: v5e
topology: v5e:2x2
jax: 0.10.0
libtpu: 0.0.40
codegen_flags: <defaults>
</compile_context>

<pallas_src>
import functools

import jax
import jax.numpy as jnp
from jax.experimental import pallas as pl
from jax.experimental.pallas import tpu as pltpu

_LANE = 128      # lane width  (last dim alignment)
_SUBLANE = 8     # sublane width (second-to-last dim alignment, f32)


def _round_up(x: int, m: int) -> int:
    return ((x + m - 1) // m) * m


def _fused_mlp_kernel(*refs, program):
    """Fused MLP: refs = (x_ref, W1, b1, W2, b2, ..., o_ref).

    `program` is a static tuple of ops:
      ("linear", param_idx, relu_after)  -> h = relu?(h @ W[param_idx] + b[param_idx])
      ("relu",)                          -> h = max(h, 0)
    All matmuls hit the MXU (f32 accumulate); bias add / ReLU run on the VPU.
    Intermediate activations stay in vregs/VMEM — nothing touches HBM between layers.
    """
    x_ref = refs[0]
    o_ref = refs[-1]
    param_refs = refs[1:-1]

    h = x_ref[...]
    for op in program:
        if op[0] == "linear":
            _, pidx, relu_after = op
            w_ref = param_refs[2 * pidx]
            b_ref = param_refs[2 * pidx + 1]
            h = jnp.dot(h, w_ref[...], preferred_element_type=jnp.float32)
            h = h + b_ref[...]                       # (1, N) broadcast over rows
            if relu_after:
                h = jnp.maximum(h, 0.0)
        elif op[0] == "relu":                        # standalone ReLU: pure VPU
            h = jnp.maximum(h, 0.0)
    o_ref[...] = h.astype(o_ref.dtype)


class FeedForwardPallas:
    """JAX/Pallas mirror of the PyTorch FeedForward: applies layers in order.

    `layers` is a list of specs:
      ("linear", W, b)  with W of shape (out_features, in_features)  (PyTorch layout)
      ("relu",)
    The full sequence is compiled into ONE fused Pallas kernel.
    """

    def __init__(self, layers):
        program = []
        params = []          # flat [W1_pad, b1_pad, W2_pad, b2_pad, ...] in (K, N) layout
        in_pad = None        # padded input feature dim (from first linear)
        out_features = None  # true output feature dim (from last linear)
        out_pad = None       # padded output feature dim (from last linear)

        i, n = 0, len(layers)
        while i < n:
            layer = layers[i]
            if layer[0] == "linear":
                _, W, b = layer
                W = jnp.asarray(W, jnp.float32)
                b = jnp.asarray(b, jnp.float32)
                out_f, in_f = W.shape
                k_pad = _round_up(in_f, _LANE)
                n_pad = _round_up(out_f, _LANE)
                # Pre-transpose once to (K, N) and zero-pad to lane-aligned shapes.
                w_pad = jnp.zeros((k_pad, n_pad), jnp.float32).at[:in_f, :out_f].set(W.T)
                b_pad = jnp.zeros((1, n_pad), jnp.float32).at[0, :out_f].set(b)

                fuse_relu = (i + 1 < n) and (layers[i + 1][0] == "relu")
                program.append(("linear", len(params) // 2, fuse_relu))
                params.extend([w_pad, b_pad])

                if in_pad is None:
                    in_pad = k_pad
                out_features, out_pad = out_f, n_pad
                i += 2 if fuse_relu else 1
            elif layer[0] == "relu":
                program.append(("relu",))
                i += 1
            else:
                raise ValueError(f"unsupported layer spec: {layer[0]}")

        self._params = params
        program = tuple(program)
        kernel = functools.partial(_fused_mlp_kernel, program=program)

        def forward(x, *flat_params):
            x = jnp.asarray(x, jnp.float32)
            M, F = x.shape
            m_pad = _round_up(max(M, 1), _SUBLANE)
            f_pad = in_pad if in_pad is not None else _round_up(F, _LANE)
            o_feats = out_features if out_features is not None else F
            o_pad = out_pad if out_pad is not None else f_pad

            # Zero-pad input once (batch -> sublane multiple, features -> lane multiple).
            x_pad = jnp.zeros((m_pad, f_pad), jnp.float32).at[:M, :F].set(x)

            y_pad = pl.pallas_call(
                kernel,
                out_shape=jax.ShapeDtypeStruct((m_pad, o_pad), jnp.float32),
                # No grid: single invocation, every operand resident in VMEM.
                in_specs=[pl.BlockSpec(memory_space=pltpu.MemorySpace.VMEM)]
                * (1 + len(flat_params)),
                out_specs=pl.BlockSpec(memory_space=pltpu.MemorySpace.VMEM),
            )(x_pad, *flat_params)

            return y_pad[:M, :o_feats]

        self._forward = jax.jit(forward)

    def __call__(self, x):
        return self._forward(x, *self._params)


def _ref_forward(layers, x):
    """Pure-JAX reference for correctness checking."""
    for layer in layers:
        if layer[0] == "linear":
            _, W, b = layer
            x = x @ W.T + b
        elif layer[0] == "relu":
            x = jnp.maximum(x, 0.0)
    return x


if __name__ == "__main__":
    key = jax.random.PRNGKey(0)
    k_x, k_w1, k_b1, k_w2, k_b2, k_w3, k_b3 = jax.random.split(key, 7)

    batch, d_in, d_hidden, d_out = 4, 16, 32, 8

    # Deterministic synthetic parameters (PyTorch nn.Linear weight layout: (out, in)).
    W1 = jax.random.normal(k_w1, (d_hidden, d_in), jnp.float32) * 0.1
    b1 = jax.random.normal(k_b1, (d_hidden,), jnp.float32) * 0.1
    W2 = jax.random.normal(k_w2, (d_hidden, d_hidden), jnp.float32) * 0.1
    b2 = jax.random.normal(k_b2, (d_hidden,), jnp.float32) * 0.1
    W3 = jax.random.normal(k_w3, (d_out, d_hidden), jnp.float32) * 0.1
    b3 = jax.random.normal(k_b3, (d_out,), jnp.float32) * 0.1

    layers = [
        ("linear", W1, b1),
        ("relu",),
        ("linear", W2, b2),
        ("relu",),
        ("linear", W3, b3),
    ]

    model = FeedForwardPallas(layers)

    x = jax.random.normal(k_x, (batch, d_in), jnp.float32)

    y = model(x)
    y = jax.block_until_ready(y)

    y_ref = _ref_forward(layers, x)
    assert y.shape == (batch, d_out)
    assert jnp.allclose(y, y_ref, atol=1e-5, rtol=1e-5), "mismatch vs reference"

    print("KERNEL_OK")
</pallas_src>

<mosaic_0001>
module attributes {stable_mosaic.version = 11 : i64} {
  func.func @_fused_mlp_kernel(%arg0: memref<8x128xf32, #tpu.memory_space<vmem>>, %arg1: memref<128x128xf32, #tpu.memory_space<vmem>>, %arg2: memref<1x128xf32, #tpu.memory_space<vmem>>, %arg3: memref<128x128xf32, #tpu.memory_space<vmem>>, %arg4: memref<1x128xf32, #tpu.memory_space<vmem>>, %arg5: memref<128x128xf32, #tpu.memory_space<vmem>>, %arg6: memref<1x128xf32, #tpu.memory_space<vmem>>, %arg7: memref<8x128xf32, #tpu.memory_space<vmem>>) attributes {dimension_semantics = [], scalar_prefetch = 0 : i64, scratch_operands = 0 : i64, tpu.core_type = #tpu.core_type<tc>} {
    %c0 = arith.constant 0 : index
    %c0_0 = arith.constant 0 : index
    %0 = vector.load %arg0[%c0, %c0_0] : memref<8x128xf32, #tpu.memory_space<vmem>>, vector<8x128xf32>
    %c0_1 = arith.constant 0 : index
    %c0_2 = arith.constant 0 : index
    %1 = vector.load %arg1[%c0_1, %c0_2] : memref<128x128xf32, #tpu.memory_space<vmem>>, vector<128x128xf32>
    %cst = arith.constant dense<0.000000e+00> : vector<8x128xf32>
    %2 = tpu.matmul %0, %1, %cst {dimension_numbers = #tpu.dot_dimension_numbers<[1], [0], [0], [1], [0, 0, 1, 1], [], []>} : vector<8x128xf32>, vector<128x128xf32>, vector<8x128xf32> -> vector<8x128xf32>
    %c0_3 = arith.constant 0 : index
    %c0_4 = arith.constant 0 : index
    %3 = vector.load %arg2[%c0_3, %c0_4] : memref<1x128xf32, #tpu.memory_space<vmem>>, vector<1x128xf32>
    %4 = vector.broadcast %3 : vector<1x128xf32> to vector<8x128xf32>
    %5 = arith.addf %2, %4 : vector<8x128xf32>
    %cst_5 = arith.constant 0.000000e+00 : f32
    %6 = vector.broadcast %cst_5 : f32 to vector<8x128xf32>
    %7 = arith.maximumf %5, %6 : vector<8x128xf32>
    %c0_6 = arith.constant 0 : index
    %c0_7 = arith.constant 0 : index
    %8 = vector.load %arg3[%c0_6, %c0_7] : memref<128x128xf32, #tpu.memory_space<vmem>>, vector<128x128xf32>
    %cst_8 = arith.constant dense<0.000000e+00> : vector<8x128xf32>
    %9 = tpu.matmul %7, %8, %cst_8 {dimension_numbers = #tpu.dot_dimension_numbers<[1], [0], [0], [1], [0, 0, 1, 1], [], []>} : vector<8x128xf32>, vector<128x128xf32>, vector<8x128xf32> -> vector<8x128xf32>
    %c0_9 = arith.constant 0 : index
    %c0_10 = arith.constant 0 : index
    %10 = vector.load %arg4[%c0_9, %c0_10] : memref<1x128xf32, #tpu.memory_space<vmem>>, vector<1x128xf32>
    %11 = vector.broadcast %10 : vector<1x128xf32> to vector<8x128xf32>
    %12 = arith.addf %9, %11 : vector<8x128xf32>
    %cst_11 = arith.constant 0.000000e+00 : f32
    %13 = vector.broadcast %cst_11 : f32 to vector<8x128xf32>
    %14 = arith.maximumf %12, %13 : vector<8x128xf32>
    %c0_12 = arith.constant 0 : index
    %c0_13 = arith.constant 0 : index
    %15 = vector.load %arg5[%c0_12, %c0_13] : memref<128x128xf32, #tpu.memory_space<vmem>>, vector<128x128xf32>
    %cst_14 = arith.constant dense<0.000000e+00> : vector<8x128xf32>
    %16 = tpu.matmul %14, %15, %cst_14 {dimension_numbers = #tpu.dot_dimension_numbers<[1], [0], [0], [1], [0, 0, 1, 1], [], []>} : vector<8x128xf32>, vector<128x128xf32>, vector<8x128xf32> -> vector<8x128xf32>
    %c0_15 = arith.constant 0 : index
    %c0_16 = arith.constant 0 : index
    %17 = vector.load %arg6[%c0_15, %c0_16] : memref<1x128xf32, #tpu.memory_space<vmem>>, vector<1x128xf32>
    %18 = vector.broadcast %17 : vector<1x128xf32> to vector<8x128xf32>
    %19 = arith.addf %16, %18 : vector<8x128xf32>
    %c0_17 = arith.constant 0 : index
    %c0_18 = arith.constant 0 : index
    %20 = vector.load %arg7[%c0_17, %c0_18] : memref<8x128xf32, #tpu.memory_space<vmem>>, vector<8x128xf32>
    tpu.vector_store %arg7[%c0_17, %c0_18], %19 {strides = array<i32>} : memref<8x128xf32, #tpu.memory_space<vmem>>, vector<8x128xf32>,
    return
  }
}

</mosaic_0001>

<bundles_post_ra>
// kernel: forward.1
= control target key start
LH: loop header
LB: loop body
LE: loop exit
PB: predicated region body
PF: predicated region fallthrough
CT: control target
= control target key end

     0   :  { %12 = vsyncpa [#allocation3], 0  ;;  %s356_s0 = inlined_call_operand.vmem [shape: f32[8,128], index: 0, kind: input, shape index: {}]   ;;  %s357_s1 = inlined_call_operand.hbm [shape: f32[128,128], index: 1, kind: input, shape index: {}]   ;;  %s358_s2 = inlined_call_operand.vmem [shape: f32[1,128], index: 2, kind: input, shape index: {}]   ;;  %s359_s3 = inlined_call_operand.hbm [shape: f32[128,128], index: 3, kind: input, shape index: {}]   ;;  %s360_s4 = inlined_call_operand.vmem [shape: f32[1,128], index: 4, kind: input, shape index: {}]   ;;  %s361_s5 = inlined_call_operand.hbm [shape: f32[128,128], index: 5, kind: input, shape index: {}]   ;;  %s362_s6 = inlined_call_operand.vmem [shape: f32[1,128], index: 6, kind: input, shape index: {}]   ;;  %s363_s7 = inlined_call_operand.vmem [shape: f32[8,128], index: 7, kind: output, shape index: {}]  }
   0x1   :  { %13 = vsyncpa [#allocation5], 0  ;;  %s35_s26 = sshll.u32 %s359_s3, 4  ;;  %s287_s27 = smov [#allocation4]   ;;  %s36_s26 = int_to_ptr.hbm [resolvable:$true] %s35_s26 }
   0x2   :  { %s37_s28 = sshll.u32 %s287_s27, 4  ;;  %s20_s8 = sshll.u32 %s357_s1, 4  ;;  %s38_s28 = int_to_ptr.vmem [resolvable:$true] %s37_s28  ;;  %s21_s8 = int_to_ptr.hbm [resolvable:$true] %s20_s8 }
   0x3   :  { %s288_s9 = smov 128   ;;  %s289_s10 = smov 8  }
   0x4   :  { %43 = dma.hbm_to_vmem [thread:$0]  %s36_s26, 2048, %s38_s28, [#allocation5], %s288_s9, %s288_s9, %s289_s10  }
   0x5   :  { %s290_s11 = smov [#allocation2]   ;;  %s50_s15 = sshll.u32 %s361_s5, 4  ;;  %s51_s15 = int_to_ptr.hbm [resolvable:$true] %s50_s15 }
   0x6   :  { %s22_s12 = sshll.u32 %s290_s11, 4  ;;  %s291_s3 = smov [#allocation6]   ;;  %s23_s12 = int_to_ptr.vmem [resolvable:$true] %s22_s12 }
   0x7   :  { %28 = dma.hbm_to_vmem [thread:$0]  %s21_s8, 2048, %s23_s12, [#allocation3], %s288_s9, %s288_s9, %s289_s10  }
   0x8   :  { %s52_s16 = sshll.u32 %s291_s3, 4  ;;  %s53_s16 = int_to_ptr.vmem [resolvable:$true] %s52_s16 }
   0x9   :  { %58 = dma.hbm_to_vmem [thread:$0]  %s51_s15, 2048, %s53_s16, [#allocation5], %s288_s9, %s288_s9, %s289_s10  }
   0xa   :  { %283 = dma.done.wait [#allocation3], 2048  }
   0xb   :  { %284 = vsyncadd [#allocation3], 4294965248 }
   0xc   :  { %285 = dma.done.wait [#allocation5], 4096  }
   0xd   :  { %286 = vsyncadd [#allocation5], 4294963200  ;;  %v89_v0 = vld [vmem:[#allocation2 + $0x78] sm:$0xff]  ;;  %v88_v1 = vld [vmem:[#allocation2 + $0x70] sm:$0xff] }
   0xe   :  { %94 = vmatpush.msra.mxu0 %v89_v0  ;;  %v87_v2 = vld [vmem:[#allocation2 + $0x68] sm:$0xff]  ;;  %v86_v3 = vld [vmem:[#allocation2 + $0x60] sm:$0xff]  ;;  %v130_v4 = vld [vmem:[#allocation4 + $0x78] sm:$0xff] }
   0xf   :  { %v85_v5 = vld [vmem:[#allocation2 + $0x58] sm:$0xff]  ;;  %135 = vmatpush.msra.mxu1 %v130_v4  ;;  %v129_v6 = vld [vmem:[#allocation4 + $0x70] sm:$0xff]  ;;  %v128_v7 = vld [vmem:[#allocation4 + $0x68] sm:$0xff] }
  0x10   :  { %95 = vmatpush.msra.mxu0 %v88_v1  ;;  %v84_v8 = vld [vmem:[#allocation2 + $0x50] sm:$0xff]  ;;  %v127_v9 = vld [vmem:[#allocation4 + $0x60] sm:$0xff]  ;;  %v83_v10 = vld [vmem:[#allocation2 + $0x48] sm:$0xff] }
  0x11   :  { %136 = vmatpush.msra.mxu1 %v129_v6  ;;  %v126_v11 = vld [vmem:[#allocation4 + $0x58] sm:$0xff]  ;;  %v82_v12 = vld [vmem:[#allocation2 + $0x40] sm:$0xff]  ;;  %v125_v13 = vld [vmem:[#allocation4 + $0x50] sm:$0xff] }
  0x12   :  { %96 = vmatpush.msra.mxu0 %v87_v2  ;;  %v81_v14 = vld [vmem:[#allocation2 + $0x38] sm:$0xff]  ;;  %v124_v15 = vld [vmem:[#allocation4 + $0x48] sm:$0xff]  ;;  %v80_v16 = vld [vmem:[#allocation2 + $0x30] sm:$0xff] }
  0x13   :  { %137 = vmatpush.msra.mxu1 %v128_v7  ;;  %v123_v17 = vld [vmem:[#allocation4 + $0x40] sm:$0xff]  ;;  %v79_v18 = vld [vmem:[#allocation2 + $0x28] sm:$0xff]  ;;  %v122_v19 = vld [vmem:[#allocation4 + $0x38] sm:$0xff] }
  0x14   :  { %97 = vmatpush.msra.mxu0 %v86_v3  ;;  %v78_v20 = vld [vmem:[#allocation2 + $0x20] sm:$0xff]  ;;  %v121_v21 = vld [vmem:[#allocation4 + $0x30] sm:$0xff]  ;;  %v77_v22 = vld [vmem:[#allocation2 + $0x18] sm:$0xff] }
  0x15   :  { %138 = vmatpush.msra.mxu1 %v127_v9  ;;  %v120_v23 = vld [vmem:[#allocation4 + $0x28] sm:$0xff]  ;;  %v76_v24 = vld [vmem:[#allocation2 + $0x10] sm:$0xff]  ;;  %v119_v25 = vld [vmem:[#allocation4 + $0x20] sm:$0xff] }
  0x16   :  { %98 = vmatpush.msra.mxu0 %v85_v5  ;;  %v75_v26 = vld [vmem:[#allocation2 + $0x8] sm:$0xff]  ;;  %v118_v27 = vld [vmem:[#allocation4 + $0x18] sm:$0xff]  ;;  %v74_v28 = vld [vmem:[#allocation2] sm:$0xff] }
  0x17   :  { %139 = vmatpush.msra.mxu1 %v126_v11  ;;  %v73_v29 = vld [vmem:[%s356_s0] sm:$0xff]  ;;  %v117_v30 = vld [vmem:[#allocation4 + $0x10] sm:$0xff]  ;;  %v116_v31 = vld [vmem:[#allocation4 + $0x8] sm:$0xff] }
  0x18   :  { %99 = vmatpush.msra.mxu0 %v84_v8  ;;  %v115_v32 = vld [vmem:[#allocation4] sm:$0xff]  ;;  %v171_v33 = vld [vmem:[#allocation6 + $0x78] sm:$0xff]  ;;  %v170_v34 = vld [vmem:[#allocation6 + $0x70] sm:$0xff] }
  0x19   :  { %140 = vmatpush.msra.mxu1 %v125_v13  ;;  %176 = vmatpush.msra.mxu2 %v171_v33  ;;  %v169_v35 = vld [vmem:[#allocation6 + $0x68] sm:$0xff]  ;;  %v168_v36 = vld [vmem:[#allocation6 + $0x60] sm:$0xff]  ;;  %v167_v37 = vld [vmem:[#allocation6 + $0x58] sm:$0xff] }
  0x1a   :  { %100 = vmatpush.msra.mxu0 %v83_v10  ;;  %v166_v38 = vld [vmem:[#allocation6 + $0x50] sm:$0xff]  ;;  %v165_v39 = vld [vmem:[#allocation6 + $0x48] sm:$0xff]  ;;  %v164_v40 = vld [vmem:[#allocation6 + $0x40] sm:$0xff] }
  0x1b   :  { %141 = vmatpush.msra.mxu1 %v124_v15  ;;  %177 = vmatpush.msra.mxu2 %v170_v34  ;;  %v163_v41 = vld [vmem:[#allocation6 + $0x38] sm:$0xff]  ;;  %v162_v42 = vld [vmem:[#allocation6 + $0x30] sm:$0xff]  ;;  %v161_v43 = vld [vmem:[#allocation6 + $0x28] sm:$0xff] }
  0x1c   :  { %101 = vmatpush.msra.mxu0 %v82_v12  ;;  %v160_v44 = vld [vmem:[#allocation6 + $0x20] sm:$0xff]  ;;  %v159_v45 = vld [vmem:[#allocation6 + $0x18] sm:$0xff]  ;;  %v158_v50 = vld [vmem:[#allocation6 + $0x10] sm:$0xff] }
  0x1d   :  { %142 = vmatpush.msra.mxu1 %v123_v17  ;;  %178 = vmatpush.msra.mxu2 %v169_v35  ;;  %v208_v46 = vld [vmem:[%s358_s2] ss:$0 sm:$0xff]  ;;  %v157_v51 = vld [vmem:[#allocation6 + $0x8] sm:$0xff] }
  0x1e   :  { %102 = vmatpush.msra.mxu0 %v81_v14  ;;  %v156_v52 = vld [vmem:[#allocation6] sm:$0xff] }
  0x1f   :  { %143 = vmatpush.msra.mxu1 %v122_v19  ;;  %179 = vmatpush.msra.mxu2 %v168_v36  ;;  %v209_v53 = vld [vmem:[%s360_s4] ss:$0 sm:$0xff] }
  0x20   :  { %103 = vmatpush.msra.mxu0 %v80_v16  ;;  %v210_v57 = vld [vmem:[%s362_s6] ss:$0 sm:$0xff] }
  0x21   :  { %144 = vmatpush.msra.mxu1 %v121_v21  ;;  %180 = vmatpush.msra.mxu2 %v167_v37 }
  0x22   :  { %104 = vmatpush.msra.mxu0 %v79_v18 }
  0x23   :  { %145 = vmatpush.msra.mxu1 %v120_v23  ;;  %181 = vmatpush.msra.mxu2 %v166_v38 }
  0x24   :  { %105 = vmatpush.msra.mxu0 %v78_v20 }
  0x25   :  { %146 = vmatpush.msra.mxu1 %v119_v25  ;;  %182 = vmatpush.msra.mxu2 %v165_v39 }
  0x26   :  { %106 = vmatpush.msra.mxu0 %v77_v22 }
  0x27   :  { %147 = vmatpush.msra.mxu1 %v118_v27  ;;  %183 = vmatpush.msra.mxu2 %v164_v40 }
  0x28   :  { %107 = vmatpush.msra.mxu0 %v76_v24 }
  0x29   :  { %148 = vmatpush.msra.mxu1 %v117_v30  ;;  %184 = vmatpush.msra.mxu2 %v163_v41 }
  0x2a   :  { %108 = vmatpush.msra.mxu0 %v75_v26 }
  0x2b   :  { %149 = vmatpush.msra.mxu1 %v116_v31  ;;  %185 = vmatpush.msra.mxu2 %v162_v42 }
  0x2c   :  { %109 = vmatpush.msra.mxu0 %v74_v28 }
  0x2d   :  { %110 = vmatmul.f32.vlgmr.msra.gmra.mxu0 %v73_v29  ;;  %150 = vmatpush.msra.mxu1 %v115_v32 }
  0x2e   :  { %186 = vmatpush.msra.mxu2 %v161_v43 }
  0x30   :  { %187 = vmatpush.msra.mxu2 %v160_v44 }
  0x32   :  { %188 = vmatpush.msra.mxu2 %v159_v45 }
  0x34   :  { %189 = vmatpush.msra.mxu2 %v158_v50 }
  0x36   :  { %190 = vmatpush.msra.mxu2 %v157_v51 }
  0x38   :  { %191 = vmatpush.msra.mxu2 %v156_v52 }
  0xaa   :  { %v111_v47 = vpop.f32.mrf.mxu0 }
  0xab   :  { %v112_v48 = vadd.f32 %v208_v46, %v111_v47 }
  0xad   :  { %v114_v49 = vmax.f32 %v112_v48, 0.0 }
  0xaf   :  { %151 = vmatmul.f32.vlgmr.msra.gmra.mxu1 %v114_v49 }
 0x12c   :  { %v152_v54 = vpop.f32.mrf.mxu1 }
 0x12d   :  { %v153_v55 = vadd.f32 %v209_v53, %v152_v54 }
 0x12f   :  { %v155_v56 = vmax.f32 %v153_v55, 0.0 }
 0x131   :  { %192 = vmatmul.f32.vlgmr.msra.gmra.mxu2 %v155_v56 }
 0x1b4   :  { %v193_v58 = vpop.f32.mrf.mxu2 }
 0x1b5   :  { %v194_v59 = vadd.f32 %v210_v57, %v193_v58 }
 0x1b7   :  { %196 = vst [vmem:[%s363_s7] sm:$0xff] %v194_v59 }
 0x1b8   :  { %201 = vsyncpa [#allocation3], 1 }
 0x1b9   :  { %202 = vsyncpa [#allocation5], 1 }

</bundles_post_ra>
